<compile_context>
chip_gen: v7x
topology: tpu7x:2x2x1
jax: 0.10.0
libtpu: 0.0.40
codegen_flags: <defaults>
</compile_context>

<pallas_src>
import functools

import numpy as np
import jax
import jax.numpy as jnp
from jax import lax
from jax.experimental import pallas as pl
from jax.experimental.pallas import tpu as pltpu

NUM_GROUPS = 4
GN_EPS = 1e-5


def _mxu_dot(a, b):
    """MXU matmul with f32 accumulate; full fp32 contract precision for f32 operands."""
    prec = (lax.Precision.HIGHEST
            if jnp.promote_types(a.dtype, b.dtype) == jnp.float32
            else lax.Precision.DEFAULT)
    return jnp.dot(a, b, preferred_element_type=jnp.float32, precision=prec)


def _upsample_kernel(x_ref, w_ref, p_ref, r_ref, g_ref, b_ref, o_ref, *, bt):
    # x_ref: (Bt, Cin, H*W)       channels on sublanes, flat spatial on lanes (NCHW view)
    # w_ref: (Cout, Cin)          1x1 conv weight
    # p_ref: (Cout, Cout)         group-averaging matrix (1/(Cg*H*W) within a group)
    # r_ref: (H*W, H*s*s*W)       one-hot nearest-upsample replication matrix
    # g_ref, b_ref: (Cout, 1)     GroupNorm affine params (f32)
    # o_ref: (Bt, Cout, H*s*s*W)  lane-dense output slab (free view of NCHW output)
    w = w_ref[...]
    p = p_ref[...]
    r = r_ref[...]
    gamma = g_ref[...]
    beta = b_ref[...]

    for b in range(bt):                                   # static unroll, bt is small
        x = x_ref[b]                                      # (Cin, H*W), native dtype
        # ---- 1x1 conv == channel matmul on the MXU (lane dim = H*W) ----
        y = _mxu_dot(w, x)                                # (Cout, H*W) f32
        # ---- GroupNorm: two-pass (centered) stats in f32 ----
        # Group combine kept as two tiny MXU matmuls: robust lowering, negligible next to
        # the replication matmul below (avoids risky sublane reshapes of (Cout,1) data).
        sum_c = jnp.sum(y, axis=1, keepdims=True)         # (Cout, 1)
        mean_c = _mxu_dot(p, sum_c)                       # (Cout, 1) per-group mean
        centered = y - mean_c
        ssq_c = jnp.sum(centered * centered, axis=1, keepdims=True)
        var_c = _mxu_dot(p, ssq_c)                        # (Cout, 1) per-group variance
        yn = centered * (gamma * lax.rsqrt(var_c + GN_EPS)) + beta   # (Cout, H*W) f32
        # ---- nearest upsample: one-hot replication matmul on the (idle) MXU ----
        # Cast down to the replication/output dtype BEFORE the s^2 blow-up.
        rep = _mxu_dot(yn.astype(r.dtype), r)             # (Cout, H*s*s*W) f32
        # Single wide, lane-dense store per sample (last dim >> 128 at realistic sizes).
        o_ref[b] = rep.astype(o_ref.dtype)


@functools.lru_cache(maxsize=None)
def _upsample_constants(H, W, scale, cout, num_groups, rep_dtype_name):
    """Shape-only constants, built once per configuration (hoisted out of the call path)."""
    cg = cout // num_groups
    ch = np.arange(cout)
    same_group = (ch[:, None] // cg) == (ch[None, :] // cg)
    p_mat = jnp.asarray(same_group.astype(np.float32) / float(cg * H * W))      # (Cout, Cout)

    # One-hot replication matrix: row (h*W + w) has ones at NCHW-flat output columns
    # (h*s + dh)*(W*s) + (w*s + dw) for all dh, dw in [0, s).
    ones_s = np.ones((1, scale), dtype=np.float32)
    rep_w = np.kron(np.eye(W, dtype=np.float32), ones_s)                         # (W, W*s)
    rep = np.kron(np.kron(np.eye(H, dtype=np.float32), ones_s), rep_w)           # (H*W, H*s*s*W)
    r_mat = jnp.asarray(rep, dtype=rep_dtype_name)
    return p_mat, r_mat


def upsample_module(x_nchw, conv_w, gamma, beta, level_diff, *,
                    out_dtype=None, max_block_bytes=2 << 20):
    """x_nchw: (B, Cin, H, W); conv_w: (Cout, Cin, 1, 1); gamma/beta: (Cout,)."""
    B, Cin, H, W = x_nchw.shape
    Cout = conv_w.shape[0]
    s = 2 ** level_diff
    Ho, Wo = H * s, W * s
    HW = H * W
    HssW = H * s * s * W
    out_dtype = jnp.dtype(x_nchw.dtype if out_dtype is None else out_dtype)

    # Glue is free (views only): no NCHW<->NHWC transposes anywhere.
    # NOTE: at production sizes prefer H*W a multiple of 128 so the x loads are unmasked.
    x_flat = x_nchw.reshape(B, Cin, HW)
    w2d = conv_w.reshape(Cout, Cin)
    gamma_col = gamma.reshape(Cout, 1).astype(jnp.float32)
    beta_col = beta.reshape(Cout, 1).astype(jnp.float32)

    # Replication matrix dtype: bf16 if the output is bf16 (exact one-hot copy), else f32.
    rep_dtype = jnp.bfloat16 if out_dtype == jnp.bfloat16 else jnp.float32
    p_mat, r_mat = _upsample_constants(H, W, s, Cout, NUM_GROUPS, jnp.dtype(rep_dtype).name)

    # Batch blocking: amortize per-grid-step overhead when a sample is small, while keeping
    # the double-buffered blocks comfortably inside VMEM on every generation (incl. v7x).
    per_sample_bytes = (Cout * HssW * out_dtype.itemsize
                        + Cin * HW * jnp.dtype(x_nchw.dtype).itemsize)
    bt = 1
    for cand in range(min(B, 8), 0, -1):
        if B % cand == 0 and cand * per_sample_bytes <= max_block_bytes:
            bt = cand
            break

    const_bytes = (HW * HssW + Cout * (Cin + Cout + 2)) * 4
    vmem_need = 2 * bt * per_sample_bytes + const_bytes    # double-buffered I/O + resident consts
    vmem_limit = int(min(max(vmem_need + (8 << 20), 32 << 20), 128 << 20))
    # TODO(synk): for very large resolutions (single-sample output block > ~16 MiB, e.g. v7x
    # with 64 MiB physical VMEM) add an H-tile grid axis over the replicate/store phase.

    kernel = functools.partial(_upsample_kernel, bt=bt)

    out = pl.pallas_call(
        kernel,
        out_shape=jax.ShapeDtypeStruct((B, Cout, HssW), out_dtype),
        grid=(B // bt,),
        in_specs=[
            pl.BlockSpec((bt, Cin, HW), lambda i: (i, 0, 0)),
            pl.BlockSpec((Cout, Cin), lambda i: (0, 0)),
            pl.BlockSpec((Cout, Cout), lambda i: (0, 0)),
            pl.BlockSpec((HW, HssW), lambda i: (0, 0)),
            pl.BlockSpec((Cout, 1), lambda i: (0, 0)),
            pl.BlockSpec((Cout, 1), lambda i: (0, 0)),
        ],
        out_specs=pl.BlockSpec((bt, Cout, HssW), lambda i: (i, 0, 0)),
        compiler_params=pltpu.CompilerParams(
            dimension_semantics=("parallel",),   # v7x follow-up: pltpu.CORE_PARALLEL here
            vmem_limit_bytes=vmem_limit),
    )(x_flat, w2d, p_mat, r_mat, gamma_col, beta_col)

    # Free view back to NCHW: lane index already encodes (h, dh, w, dw) = NCHW flat spatial.
    return out.reshape(B, Cout, Ho, Wo)


def _reference(x, conv_w, gamma, beta, level_diff):
    """Pure-JAX reference matching the PyTorch module (NCHW throughout, f32 stats)."""
    B, Cin, H, W = x.shape
    Cout = conv_w.shape[0]
    s = 2 ** level_diff
    y = jnp.einsum('oc,bchw->bohw',
                   conv_w.reshape(Cout, Cin).astype(jnp.float32),
                   x.astype(jnp.float32),
                   precision=lax.Precision.HIGHEST)
    yg = y.reshape(B, NUM_GROUPS, Cout // NUM_GROUPS, H, W)
    mean = jnp.mean(yg, axis=(2, 3, 4), keepdims=True)
    var = jnp.mean((yg - mean) ** 2, axis=(2, 3, 4), keepdims=True)
    yn = ((yg - mean) * lax.rsqrt(var + GN_EPS)).reshape(B, Cout, H, W)
    yn = yn * gamma.reshape(1, Cout, 1, 1) + beta.reshape(1, Cout, 1, 1)
    return jnp.repeat(jnp.repeat(yn, s, axis=2), s, axis=3).astype(x.dtype)


if __name__ == "__main__":
    # Config mirroring UpsampleModule(num_channels=[8, 16], in_res=1, out_res=0):
    #   inp_chan = 16, out_chan = 8, level_diff = 1 (nearest upsample x2)
    num_channels = [8, 16]
    in_res, out_res = 1, 0
    inp_chan = num_channels[in_res]
    out_chan = num_channels[out_res]
    level_diff = in_res - out_res

    B, H, W = 2, 8, 8

    key = jax.random.PRNGKey(0)
    kx, kw, kg, kb = jax.random.split(key, 4)
    x = jax.random.normal(kx, (B, inp_chan, H, W), dtype=jnp.float32) + 0.5
    conv_w = jax.random.normal(kw, (out_chan, inp_chan, 1, 1), dtype=jnp.float32) * 0.1
    gamma = 1.0 + 0.1 * jax.random.normal(kg, (out_chan,), dtype=jnp.float32)
    beta = 0.1 * jax.random.normal(kb, (out_chan,), dtype=jnp.float32)

    out = jax.block_until_ready(upsample_module(x, conv_w, gamma, beta, level_diff))

    ref = _reference(x, conv_w, gamma, beta, level_diff)
    assert out.shape == (B, out_chan, H * 2, W * 2), out.shape
    max_err = float(jnp.max(jnp.abs(out - ref)))
    assert jnp.allclose(out, ref, atol=1e-3, rtol=1e-3), max_err

    print("KERNEL_OK")
</pallas_src>

<mosaic_0001>
module attributes {stable_mosaic.version = 11 : i64} {
  func.func @_upsample_kernel(%arg0: i32, %arg1: memref<2x16x64xf32, #tpu.memory_space<vmem>>, %arg2: memref<8x16xf32, #tpu.memory_space<vmem>>, %arg3: memref<8x8xf32, #tpu.memory_space<vmem>>, %arg4: memref<64x256xf32, #tpu.memory_space<vmem>>, %arg5: memref<8x1xf32, #tpu.memory_space<vmem>>, %arg6: memref<8x1xf32, #tpu.memory_space<vmem>>, %arg7: memref<2x8x256xf32, #tpu.memory_space<vmem>>) attributes {dimension_semantics = [#tpu.dimension_semantics<parallel>], iteration_bounds = array<i64: 1>, scalar_prefetch = 0 : i64, scratch_operands = 0 : i64, tpu.core_type = #tpu.core_type<tc>, window_params = [{transform_indices = @transform_0, window_bounds = array<i64: 2, 16, 64>}, {pipeline_mode = #tpu.pipeline_mode<synchronous>, transform_indices = @transform_1, window_bounds = array<i64: 8, 16>}, {pipeline_mode = #tpu.pipeline_mode<synchronous>, transform_indices = @transform_2, window_bounds = array<i64: 8, 8>}, {pipeline_mode = #tpu.pipeline_mode<synchronous>, transform_indices = @transform_3, window_bounds = array<i64: 64, 256>}, {pipeline_mode = #tpu.pipeline_mode<synchronous>, transform_indices = @transform_4, window_bounds = array<i64: 8, 1>}, {pipeline_mode = #tpu.pipeline_mode<synchronous>, transform_indices = @transform_5, window_bounds = array<i64: 8, 1>}, {transform_indices = @transform_6, window_bounds = array<i64: 2, 8, 256>}]} {
    %c0 = arith.constant 0 : index
    %c0_0 = arith.constant 0 : index
    %0 = vector.load %arg2[%c0, %c0_0] : memref<8x16xf32, #tpu.memory_space<vmem>>, vector<8x16xf32>
    %c0_1 = arith.constant 0 : index
    %c0_2 = arith.constant 0 : index
    %1 = vector.load %arg3[%c0_1, %c0_2] : memref<8x8xf32, #tpu.memory_space<vmem>>, vector<8x8xf32>
    %c0_3 = arith.constant 0 : index
    %c0_4 = arith.constant 0 : index
    %2 = vector.load %arg4[%c0_3, %c0_4] : memref<64x256xf32, #tpu.memory_space<vmem>>, vector<64x256xf32>
    %c0_5 = arith.constant 0 : index
    %c0_6 = arith.constant 0 : index
    %3 = vector.load %arg5[%c0_5, %c0_6] : memref<8x1xf32, #tpu.memory_space<vmem>>, vector<8x1xf32>
    %c0_7 = arith.constant 0 : index
    %c0_8 = arith.constant 0 : index
    %4 = vector.load %arg6[%c0_7, %c0_8] : memref<8x1xf32, #tpu.memory_space<vmem>>, vector<8x1xf32>
    %c0_9 = arith.constant 0 : index
    %c0_10 = arith.constant 0 : index
    %c0_11 = arith.constant 0 : index
    %5 = vector.load %arg1[%c0_9, %c0_10, %c0_11] : memref<2x16x64xf32, #tpu.memory_space<vmem>>, vector<1x16x64xf32>
    %6 = vector.shape_cast %5 : vector<1x16x64xf32> to vector<16x64xf32>
    %cst = arith.constant dense<0.000000e+00> : vector<8x64xf32>
    %7 = tpu.matmul %0, %6, %cst {dimension_numbers = #tpu.dot_dimension_numbers<[1], [0], [0], [1], [0, 0, 1, 1], [], []>, precision = #tpu.contract_precision<fp32>} : vector<8x16xf32>, vector<16x64xf32>, vector<8x64xf32> -> vector<8x64xf32>
    %cst_12 = arith.constant dense<0.000000e+00> : vector<8xf32>
    %8 = vector.multi_reduction <add>, %7, %cst_12 [1] : vector<8x64xf32> to vector<8xf32>
    %9 = vector.shape_cast %8 : vector<8xf32> to vector<8x1xf32>
    %cst_13 = arith.constant dense<0.000000e+00> : vector<8x1xf32>
    %10 = tpu.matmul %1, %9, %cst_13 {dimension_numbers = #tpu.dot_dimension_numbers<[1], [0], [0], [1], [0, 0, 1, 1], [], []>, precision = #tpu.contract_precision<fp32>} : vector<8x8xf32>, vector<8x1xf32>, vector<8x1xf32> -> vector<8x1xf32>
    %11 = vector.broadcast %10 : vector<8x1xf32> to vector<8x64xf32>
    %12 = arith.subf %7, %11 : vector<8x64xf32>
    %13 = arith.mulf %12, %12 : vector<8x64xf32>
    %cst_14 = arith.constant dense<0.000000e+00> : vector<8xf32>
    %14 = vector.multi_reduction <add>, %13, %cst_14 [1] : vector<8x64xf32> to vector<8xf32>
    %15 = vector.shape_cast %14 : vector<8xf32> to vector<8x1xf32>
    %cst_15 = arith.constant dense<0.000000e+00> : vector<8x1xf32>
    %16 = tpu.matmul %1, %15, %cst_15 {dimension_numbers = #tpu.dot_dimension_numbers<[1], [0], [0], [1], [0, 0, 1, 1], [], []>, precision = #tpu.contract_precision<fp32>} : vector<8x8xf32>, vector<8x1xf32>, vector<8x1xf32> -> vector<8x1xf32>
    %cst_16 = arith.constant 9.99999974E-6 : f32
    %17 = vector.broadcast %cst_16 : f32 to vector<8x1xf32>
    %18 = arith.addf %16, %17 : vector<8x1xf32>
    %19 = math.rsqrt %18 : vector<8x1xf32>
    %20 = arith.mulf %3, %19 : vector<8x1xf32>
    %21 = vector.broadcast %20 : vector<8x1xf32> to vector<8x64xf32>
    %22 = arith.mulf %12, %21 : vector<8x64xf32>
    %23 = vector.broadcast %4 : vector<8x1xf32> to vector<8x64xf32>
    %24 = arith.addf %22, %23 : vector<8x64xf32>
    %cst_17 = arith.constant dense<0.000000e+00> : vector<8x256xf32>
    %25 = tpu.matmul %24, %2, %cst_17 {dimension_numbers = #tpu.dot_dimension_numbers<[1], [0], [0], [1], [0, 0, 1, 1], [], []>, precision = #tpu.contract_precision<fp32>} : vector<8x64xf32>, vector<64x256xf32>, vector<8x256xf32> -> vector<8x256xf32>
    %c0_18 = arith.constant 0 : index
    %c0_19 = arith.constant 0 : index
    %c0_20 = arith.constant 0 : index
    %26 = vector.load %arg7[%c0_18, %c0_19, %c0_20] : memref<2x8x256xf32, #tpu.memory_space<vmem>>, vector<1x8x256xf32>
    %27 = vector.shape_cast %26 : vector<1x8x256xf32> to vector<8x256xf32>
    %28 = vector.shape_cast %25 : vector<8x256xf32> to vector<1x8x256xf32>
    tpu.vector_store %arg7[%c0_18, %c0_19, %c0_20], %28 {strides = array<i32>} : memref<2x8x256xf32, #tpu.memory_space<vmem>>, vector<1x8x256xf32>,
    %c1 = arith.constant 1 : index
    %c0_21 = arith.constant 0 : index
    %c0_22 = arith.constant 0 : index
    %29 = vector.load %arg1[%c1, %c0_21, %c0_22] : memref<2x16x64xf32, #tpu.memory_space<vmem>>, vector<1x16x64xf32>
    %30 = vector.shape_cast %29 : vector<1x16x64xf32> to vector<16x64xf32>
    %cst_23 = arith.constant dense<0.000000e+00> : vector<8x64xf32>
    %31 = tpu.matmul %0, %30, %cst_23 {dimension_numbers = #tpu.dot_dimension_numbers<[1], [0], [0], [1], [0, 0, 1, 1], [], []>, precision = #tpu.contract_precision<fp32>} : vector<8x16xf32>, vector<16x64xf32>, vector<8x64xf32> -> vector<8x64xf32>
    %cst_24 = arith.constant dense<0.000000e+00> : vector<8xf32>
    %32 = vector.multi_reduction <add>, %31, %cst_24 [1] : vector<8x64xf32> to vector<8xf32>
    %33 = vector.shape_cast %32 : vector<8xf32> to vector<8x1xf32>
    %cst_25 = arith.constant dense<0.000000e+00> : vector<8x1xf32>
    %34 = tpu.matmul %1, %33, %cst_25 {dimension_numbers = #tpu.dot_dimension_numbers<[1], [0], [0], [1], [0, 0, 1, 1], [], []>, precision = #tpu.contract_precision<fp32>} : vector<8x8xf32>, vector<8x1xf32>, vector<8x1xf32> -> vector<8x1xf32>
    %35 = vector.broadcast %34 : vector<8x1xf32> to vector<8x64xf32>
    %36 = arith.subf %31, %35 : vector<8x64xf32>
    %37 = arith.mulf %36, %36 : vector<8x64xf32>
    %cst_26 = arith.constant dense<0.000000e+00> : vector<8xf32>
    %38 = vector.multi_reduction <add>, %37, %cst_26 [1] : vector<8x64xf32> to vector<8xf32>
    %39 = vector.shape_cast %38 : vector<8xf32> to vector<8x1xf32>
    %cst_27 = arith.constant dense<0.000000e+00> : vector<8x1xf32>
    %40 = tpu.matmul %1, %39, %cst_27 {dimension_numbers = #tpu.dot_dimension_numbers<[1], [0], [0], [1], [0, 0, 1, 1], [], []>, precision = #tpu.contract_precision<fp32>} : vector<8x8xf32>, vector<8x1xf32>, vector<8x1xf32> -> vector<8x1xf32>
    %cst_28 = arith.constant 9.99999974E-6 : f32
    %41 = vector.broadcast %cst_28 : f32 to vector<8x1xf32>
    %42 = arith.addf %40, %41 : vector<8x1xf32>
    %43 = math.rsqrt %42 : vector<8x1xf32>
    %44 = arith.mulf %3, %43 : vector<8x1xf32>
    %45 = vector.broadcast %44 : vector<8x1xf32> to vector<8x64xf32>
    %46 = arith.mulf %36, %45 : vector<8x64xf32>
    %47 = vector.broadcast %4 : vector<8x1xf32> to vector<8x64xf32>
    %48 = arith.addf %46, %47 : vector<8x64xf32>
    %cst_29 = arith.constant dense<0.000000e+00> : vector<8x256xf32>
    %49 = tpu.matmul %48, %2, %cst_29 {dimension_numbers = #tpu.dot_dimension_numbers<[1], [0], [0], [1], [0, 0, 1, 1], [], []>, precision = #tpu.contract_precision<fp32>} : vector<8x64xf32>, vector<64x256xf32>, vector<8x256xf32> -> vector<8x256xf32>
    %c1_30 = arith.constant 1 : index
    %c0_31 = arith.constant 0 : index
    %c0_32 = arith.constant 0 : index
    %50 = vector.load %arg7[%c1_30, %c0_31, %c0_32] : memref<2x8x256xf32, #tpu.memory_space<vmem>>, vector<1x8x256xf32>
    %51 = vector.shape_cast %50 : vector<1x8x256xf32> to vector<8x256xf32>
    %52 = vector.shape_cast %49 : vector<8x256xf32> to vector<1x8x256xf32>
    tpu.vector_store %arg7[%c1_30, %c0_31, %c0_32], %52 {strides = array<i32>} : memref<2x8x256xf32, #tpu.memory_space<vmem>>, vector<1x8x256xf32>,
    return
  }
  func.func @transform_0(%arg0: i32) -> (i32, i32, i32) {
    %c0_i32 = arith.constant 0 : i32
    %c0_i32_0 = arith.constant 0 : i32
    %c0_i32_1 = arith.constant 0 : i32
    return %arg0, %c0_i32, %c0_i32_0 : i32, i32, i32
  }
  func.func @transform_1(%arg0: i32) -> (i32, i32) {
    %c0_i32 = arith.constant 0 : i32
    %c0_i32_0 = arith.constant 0 : i32
    %c0_i32_1 = arith.constant 0 : i32
    return %c0_i32, %c0_i32_0 : i32, i32
  }
  func.func @transform_2(%arg0: i32) -> (i32, i32) {
    %c0_i32 = arith.constant 0 : i32
    %c0_i32_0 = arith.constant 0 : i32
    %c0_i32_1 = arith.constant 0 : i32
    return %c0_i32, %c0_i32_0 : i32, i32
  }
  func.func @transform_3(%arg0: i32) -> (i32, i32) {
    %c0_i32 = arith.constant 0 : i32
    %c0_i32_0 = arith.constant 0 : i32
    %c0_i32_1 = arith.constant 0 : i32
    return %c0_i32, %c0_i32_0 : i32, i32
  }
  func.func @transform_4(%arg0: i32) -> (i32, i32) {
    %c0_i32 = arith.constant 0 : i32
    %c0_i32_0 = arith.constant 0 : i32
    %c0_i32_1 = arith.constant 0 : i32
    return %c0_i32, %c0_i32_0 : i32, i32
  }
  func.func @transform_5(%arg0: i32) -> (i32, i32) {
    %c0_i32 = arith.constant 0 : i32
    %c0_i32_0 = arith.constant 0 : i32
    %c0_i32_1 = arith.constant 0 : i32
    return %c0_i32, %c0_i32_0 : i32, i32
  }
  func.func @transform_6(%arg0: i32) -> (i32, i32, i32) {
    %c0_i32 = arith.constant 0 : i32
    %c0_i32_0 = arith.constant 0 : i32
    %c0_i32_1 = arith.constant 0 : i32
    return %arg0, %c0_i32, %c0_i32_0 : i32, i32, i32
  }
}

</mosaic_0001>

<bundles_post_ra>
// kernel: tpu_custom_call.1
= control target key start
LH: loop header
LB: loop body
LE: loop exit
PB: predicated region body
PF: predicated region fallthrough
CT: control target
= control target key end

     0   :  { %11 = vsyncpa [#allocation3], 0  ;;  %s5389_s0 = inlined_call_operand.hbm [shape: f32[2,16,64], index: 0, kind: input, shape index: {}]   ;;  %s5390_s1 = inlined_call_operand.vmem [shape: f32[8,16], index: 1, kind: input, shape index: {}]   ;;  %s5391_s2 = inlined_call_operand.vmem [shape: f32[8,8], index: 2, kind: input, shape index: {}]   ;;  %s5392_s3 = inlined_call_operand.hbm [shape: f32[64,256], index: 3, kind: input, shape index: {}]   ;;  %s5393_s4 = inlined_call_operand.vmem [shape: f32[8,1], index: 4, kind: input, shape index: {}]   ;;  %s5394_s5 = inlined_call_operand.vmem [shape: f32[8,1], index: 5, kind: input, shape index: {}]   ;;  %s5395_s6 = inlined_call_operand.hbm [shape: f32[2,8,256], index: 6, kind: output, shape index: {}]  }
   0x1   :  { %12 = vsyncpa [#allocation6], 0 }
   0x2   :  { %13 = vsyncpa [#allocation4], 0  ;;  %s4847_s21 = smov [#allocation2]   ;;  %s4775_s25 = scalar_lea.hbm %s5389_s0, 512 }
   0x3   :  { %s19_s22 = sshll.u32 %s4847_s21, 4  ;;  %p4776_p0 = scmp.ne.s32.totalorder %s5389_s0, %s4775_s25  ;;  %s20_s22 = int_to_ptr.vmem [resolvable:$true] %s19_s22 }
   0x4   :  { %p4779_p1 = scmp.lt.u32.totalorder %s4775_s25, %s5389_s0 }
   0x6   :  { %p4781_p2 = pnand %p4779_p1, %p4776_p0 }
   0x8   :  { %4784 = shalt.err (!%p4781_p2)
}
   0x9   :  { %s4785_s30 = scalar_lea.vmem %s20_s22, 512  ;;  %p4790_p4 = scmp.lt.s32.totalorder %s20_s22, %s20_s22 }
   0xa   :  { %p4786_p3 = scmp.ne.s32.totalorder %s20_s22, %s4785_s30  ;;  %p4791_p5 = scmp.lt.s32.totalorder %s4785_s30, %s4785_s30 }
   0xc   :  { %p4792_p6 = por %p4791_p5, %p4790_p4 }
   0xe   :  { %p4793_p7 = pnand %p4792_p6, %p4786_p3 }
  0x10   :  { %4796 = shalt.err (!%p4793_p7)
}
  0x11   :  { %s4848_s7 = smov 128   ;;  %s4849_s8 = smov 8  }
  0x12   :  { %25 = dma.hbm_to_vmem [thread:$0]  %s5389_s0, 512, %s20_s22, [#allocation3], %s4848_s7, %s4848_s7, %s4849_s8  }
  0x13   :  { %s4850_s11 = smov [#allocation5]   ;;  %s4797_s15 = scalar_lea.hbm %s5392_s3, 2048 }
  0x14   :  { %s35_s12 = sshll.u32 %s4850_s11, 4  ;;  %p4798_p8 = scmp.ne.s32.totalorder %s5392_s3, %s4797_s15  ;;  %s36_s12 = int_to_ptr.vmem [resolvable:$true] %s35_s12 }
  0x15   :  { %p4801_p9 = scmp.lt.u32.totalorder %s4797_s15, %s5392_s3 }
  0x17   :  { %p4803_p10 = pnand %p4801_p9, %p4798_p8 }
  0x19   :  { %4806 = shalt.err (!%p4803_p10)
}
  0x1a   :  { %s4807_s20 = scalar_lea.vmem %s36_s12, 2048  ;;  %p4812_p12 = scmp.lt.s32.totalorder %s36_s12, %s36_s12 }
  0x1b   :  { %p4808_p11 = scmp.ne.s32.totalorder %s36_s12, %s4807_s20  ;;  %p4813_p13 = scmp.lt.s32.totalorder %s4807_s20, %s4807_s20 }
  0x1d   :  { %p4814_p0 = por %p4813_p13, %p4812_p12 }
  0x1f   :  { %p4815_p1 = pnand %p4814_p0, %p4808_p11 }
  0x21   :  { %4818 = shalt.err (!%p4815_p1)
}
  0x22   :  { %s4851_s0 = smov 256   ;;  %s4852_s21 = smov 16  }
  0x23   :  { %41 = dma.hbm_to_vmem [thread:$0]  %s5392_s3, 2048, %s36_s12, [#allocation6], %s4851_s0, %s4851_s0, %s4852_s21  }
  0x24   :  { %4841 = dma.done.wait [#allocation3], 512  }
  0x25   :  { %4842 = vsyncadd [#allocation3], 4294966784 }
  0x26   :  { %4843 = dma.done.wait [#allocation6], 2048  }
  0x27   :  { %4844 = vsyncadd [#allocation6], 4294965248  ;;  %v4853_v0 = vmov 0.0|0.0   ;;  %vm4854_vm0 = vmmov 0   ;;  %v5396_v1 = vmov 0.0   ;;  %vm74_vm1 = vcmask 130048  }
  0x28   :  { %4448 = vmatprep.subr.bf16.mxu0 %v4853_v0  ;;  %4248 = vmatprep.mubr.msk.f32.mxu0 %vm4854_vm0, %v5396_v1  ;;  %v72_v2 = vld [vmem:[#allocation2] sm:$0xff]  ;;  %v73_v3 = vld [vmem:[#allocation2 + $0x8] sm:$0xff]  ;;  %vm537_vm2 = vcmask 523264   ;;  %v4856_v28 = vmov 0   ;;  %vm541_vm3 = vcmask 64512   ;;  %v2114_v54 = vld [vmem:[#allocation2 + $0x10] sm:$0xff] }
  0x29   :  { %4286 = vmatprep.subr.mxu1 %v5396_v1  ;;  %4288 = vmatprep.mubr.msk.f32.mxu1 %vm4854_vm0, %v5396_v1  ;;  %v52_v4 = vld [vmem:[%s5390_s1] sm:$0xff]  ;;  %v79_v5 = vand.u32 4294901760, %v72_v2  ;;  %v82_v6 = vand.u32 4294901760, %v73_v3  ;;  %v2115_v55 = vld [vmem:[#allocation2 + $0x18] sm:$0xff]  ;;  %v2117_v56 = vand.u32 4294901760, %v2114_v54 }
  0x2a   :  { %v76_v7 = vsel %vm74_vm1, %v52_v4, 0  ;;  %4769 = vset.pattern.permute.xlu0 %v4856_v28  ;;  %4770 = vset.pattern.permute.xlu1 %v4856_v28  ;;  %v53_v29 = vld [vmem:[%s5391_s2] sm:$0xff]  ;;  %v2120_v57 = vand.u32 4294901760, %v2115_v55 }
  0x2b   :  { %v4929_v8 = vand.u32 4294901760, %v76_v7  ;;  %v4449_v9 = vpack.c.bf16 %v82_v6, %v79_v5  ;;  %v157_v10 = vsub.f32 %v72_v2, %v79_v5  ;;  %v164_v11 = vsub.f32 %v73_v3, %v82_v6  ;;  %v58_v28 = vld [vmem:[#allocation5 + $0x20] sm:$0xff] }
  0x2c   :  { %v543_v30 = vsel %vm541_vm3, %v53_v29, 0  ;;  %v2195_v58 = vsub.f32 %v2114_v54, %v2117_v56  ;;  %v2202_v59 = vsub.f32 %v2115_v55, %v2120_v57  ;;  %v4563_v2 = vpack.c.bf16 %v2120_v57, %v2117_v56  ;;  %v60_v29 = vld [vmem:[#allocation5 + $0x30] sm:$0xff]  ;;  %v66_v57 = vld [vmem:[#allocation5 + $0x60] sm:$0xff] }
  0x2d   :  { %v4932_v12 = vsub.f32 %v76_v7, %v4929_v8  ;;  %4450 = vmatpush3.bf16.msra.mxu0 %v4449_v9  ;;  %v158_v13 = vand.u32 4294901760, %v157_v10  ;;  %v165_v14 = vand.u32 4294901760, %v164_v11  ;;  %v4455_v23 = vpack.c.bf16 %v164_v11, %v157_v10 }
  0x2e   :  { %4451 = vmatprep.subr.bf16.mxu0 %v4853_v0  ;;  %v4967_v31 = vand.u32 4294901760, %v543_v30  ;;  %v2196_v60 = vand.u32 4294901760, %v2195_v58  ;;  %v2203_v61 = vand.u32 4294901760, %v2202_v59  ;;  %v4569_v6 = vpack.c.bf16 %v2202_v59, %v2195_v58 }
  0x2f   :  { %v4935_v15 = vand.u32 4294901760, %v4932_v12  ;;  %v159_v16 = vsub.f32 %v157_v10, %v158_v13  ;;  %v166_v17 = vsub.f32 %v164_v11, %v165_v14  ;;  %v4461_v24 = vpack.c.bf16 %v165_v14, %v158_v13  ;;  %v57_v13 = vld [vmem:[#allocation5 + $0x18] sm:$0xff] }
  0x30   :  { %v4970_v32 = vsub.f32 %v543_v30, %v4967_v31  ;;  %v2197_v62 = vsub.f32 %v2195_v58, %v2196_v60  ;;  %v2204_v63 = vsub.f32 %v2202_v59, %v2203_v61  ;;  %v4575_v7 = vpack.c.bf16 %v2203_v61, %v2196_v60  ;;  %v68_v58 = vld [vmem:[#allocation5 + $0x70] sm:$0xff] }
  0x31   :  { %v148_v18 = vsub.f32 %v4932_v12, %v4935_v15  ;;  %v160_v19 = vand.u32 4294901760, %v159_v16  ;;  %v167_v20 = vand.u32 4294901760, %v166_v17  ;;  %v1468_v16 = vand.u32 4294901760, %v57_v13  ;;  %v54_v17 = vld [vmem:[#allocation5] sm:$0xff] }
  0x32   :  { %v4973_v33 = vand.u32 4294901760, %v4970_v32  ;;  %v2198_v3 = vand.u32 4294901760, %v2197_v62  ;;  %v2205_v4 = vand.u32 4294901760, %v2204_v63  ;;  %v1474_v30 = vand.u32 4294901760, %v58_v28 }
  0x33   :  { %v4940_v21 = vand.u32 4294901760, %v148_v18  ;;  %v4452_v22 = vpack.c.bf16 %v167_v20, %v160_v19  ;;  %v56_v18 = vld [vmem:[#allocation5 + $0x10] sm:$0xff]  ;;  %v1466_v19 = vand.u32 4294901760, %v54_v17  ;;  %v1490_v61 = vand.u32 4294901760, %v66_v57 }
  0x34   :  { %v614_v34 = vsub.f32 %v4970_v32, %v4973_v33  ;;  %v4566_v5 = vpack.c.bf16 %v2205_v4, %v2198_v3  ;;  %v1470_v20 = vand.u32 4294901760, %v56_v18  ;;  %v1494_v62 = vand.u32 4294901760, %v68_v58 }
  0x35   :  { %4249 = vmatmul.mubr.f32.vlgmr.msra.gmra.mrb[0].mxu0 %v4940_v21 }
  0x36   :  { %4453 = vmatpush3.bf16.msra.mxu0 %v4452_v22  ;;  %4255 = vmatprep.mubr.msk.f32.mxu0 %vm4854_vm0, %v5396_v1  ;;  %v4977_v36 = vand.u32 4294901760, %v614_v34  ;;  %v5064_v22 = vpack.c.bf16 %v1470_v20, %v1466_v19  ;;  %v1478_v34 = vand.u32 4294901760, %v60_v29  ;;  %v5087_v54 = vsub.f32 %v56_v18, %v1470_v20 }
  0x37   :  { %4454 = vmatprep.subr.bf16.mxu0 %v4853_v0 }
  0x3d   :  { %4256 = vmatmul.mubr.f32.vlgmr.msra.gmra.mrb[0].mxu0 %v4929_v8 }
  0x3e   :  { %4456 = vmatpush3.bf16.msra.mxu0 %v4455_v23  ;;  %4262 = vmatprep.mubr.msk.f32.mxu0 %vm4854_vm0, %v5396_v1  ;;  %v59_v23 = vld [vmem:[#allocation5 + $0x28] sm:$0xff] }
  0x3f   :  { %4457 = vmatprep.subr.bf16.mxu0 %v4853_v0 }
  0x45   :  { %4263 = vmatmul.mubr.f32.vlgmr.msra.gmra.mrb[0].mxu0 %v4932_v12 }
  0x46   :  { %4459 = vmatpush3.bf16.msra.mxu0 %v4449_v9  ;;  %4269 = vmatprep.mubr.msk.f32.mxu0 %vm4854_vm0, %v5396_v1 }
  0x47   :  { %4460 = vmatprep.subr.bf16.mxu0 %v4853_v0 }
  0x4d   :  { %4270 = vmatmul.mubr.f32.vlgmr.msra.gmra.mrb[0].mxu0 %v4935_v15 }
  0x4e   :  { %4462 = vmatpush3.bf16.msra.mxu0 %v4461_v24  ;;  %4276 = vmatprep.mubr.msk.f32.mxu0 %vm4854_vm0, %v5396_v1  ;;  %v61_v24 = vld [vmem:[#allocation5 + $0x38] sm:$0xff] }
  0x4f   :  { %4463 = vmatprep.subr.bf16.mxu0 %v4853_v0 }
  0x55   :  { %4277 = vmatmul.mubr.f32.vlgmr.msra.gmra.mrb[0].mxu0 %v4929_v8 }
  0x56   :  { %4465 = vmatpush3.bf16.msra.mxu0 %v4449_v9  ;;  %4283 = vmatprep.mubr.msk.f32.mxu0 %vm4854_vm0, %v5396_v1 }
  0x5d   :  { %4284 = vmatmul.mubr.f32.vlgmr.msra.gmra.mrb[0].mxu0 %v4929_v8 }
  0x5e   :  { %1544 = vmatprep.mubr.f32.mxu0 %v5396_v1 }
 0x130   :  { %v533_v25 = vpop.f32.mrb[0].mxu0 }
 0x131   :  { %v4285_v26 = vpop.f32.mrb[1].mxu0  ;;  %v538_v27 = vsel %vm537_vm2, %v533_v25, 0.0 }
 0x132   :  { %539 = vadd.xlane.f32.xlu0 %v538_v27  ;;  %v1472_v26 = vand.u32 4294901760, %v59_v23  ;;  %v1476_v27 = vand.u32 4294901760, %v61_v24 }
 0x1bf   :  { %v540_v35 = vpop.xlane.xlu0 %539 }
 0x1c0   :  { %v546_v37 = vand.u32 4294901760, %v540_v35 }
 0x1c2   :  { %v623_v38 = vsub.f32 %v540_v35, %v546_v37  ;;  %4287 = vmatpush3.msra.mxu1 %v546_v37  ;;  %v5071_v35 = vpack.c.bf16 %v1476_v27, %v1472_v26 }
 0x1c3   :  { %4289 = vmatmul.mubr.f32.vlgmr.msra.gmra.mrb[0].mxu1 %v4977_v36  ;;  %4291 = vmatprep.subr.mxu1 %v5396_v1 }
 0x1c4   :  { %v624_v39 = vand.u32 4294901760, %v623_v38  ;;  %4293 = vmatprep.mubr.msk.f32.mxu1 %vm4854_vm0, %v5396_v1 }
 0x1c6   :  { %v625_v40 = vsub.f32 %v623_v38, %v624_v39 }
 0x1c8   :  { %v626_v41 = vand.u32 4294901760, %v625_v40 }
 0x1ca   :  { %4292 = vmatpush3.msra.mxu1 %v626_v41 }
 0x1cb   :  { %4294 = vmatmul.mubr.f32.vlgmr.msra.gmra.mrb[0].mxu1 %v4967_v31  ;;  %4296 = vmatprep.subr.mxu1 %v5396_v1 }
 0x1cc   :  { %4297 = vmatpush3.msra.mxu1 %v623_v38  ;;  %4298 = vmatprep.mubr.msk.f32.mxu1 %vm4854_vm0, %v5396_v1  ;;  %v63_v38 = vld [vmem:[#allocation5 + $0x48] sm:$0xff] }
 0x1cd   :  { %4301 = vmatprep.subr.mxu1 %v5396_v1  ;;  %v1480_v40 = vand.u32 4294901760, %v63_v38 }
 0x1d3   :  { %4299 = vmatmul.mubr.f32.vlgmr.msra.gmra.mrb[0].mxu1 %v4970_v32 }
 0x1d4   :  { %4302 = vmatpush3.msra.mxu1 %v546_v37  ;;  %4303 = vmatprep.mubr.msk.f32.mxu1 %vm4854_vm0, %v5396_v1 }
 0x1d5   :  { %4306 = vmatprep.subr.mxu1 %v5396_v1 }
 0x1db   :  { %4304 = vmatmul.mubr.f32.vlgmr.msra.gmra.mrb[0].mxu1 %v4973_v33 }
 0x1dc   :  { %4307 = vmatpush3.msra.mxu1 %v624_v39  ;;  %4308 = vmatprep.mubr.msk.f32.mxu1 %vm4854_vm0, %v5396_v1  ;;  %v65_v39 = vld [vmem:[#allocation5 + $0x58] sm:$0xff] }
 0x1dd   :  { %4311 = vmatprep.subr.mxu1 %v5396_v1  ;;  %v1484_v41 = vand.u32 4294901760, %v65_v39 }
 0x1e3   :  { %4309 = vmatmul.mubr.f32.vlgmr.msra.gmra.mrb[0].mxu1 %v4967_v31 }
 0x1e4   :  { %4312 = vmatpush3.msra.mxu1 %v546_v37  ;;  %4313 = vmatprep.mubr.msk.f32.mxu1 %vm4854_vm0, %v5396_v1  ;;  %v5073_v37 = vpack.c.bf16 %v1478_v34, %v1474_v30 }
 0x1e5   :  { %4316 = vmatprep.subr.mxu1 %v5396_v1 }
 0x1eb   :  { %4314 = vmatmul.mubr.f32.vlgmr.msra.gmra.mrb[0].mxu1 %v4967_v31 }
 0x1ec   :  { %4318 = vmatprep.mubr.msk.f32.mxu1 %vm4854_vm0, %v5396_v1 }
 0x2be   :  { %v987_v42 = vpop.f32.mrb[0].mxu1 }
 0x2bf   :  { %993 = vperm.xlu0 %4769, %v987_v42   ;;  %v4315_v43 = vpop.f32.mrb[1].mxu1  ;;  %v62_v42 = vld [vmem:[#allocation5 + $0x40] sm:$0xff] }
 0x2c0   :  { %v64_v43 = vld [vmem:[#allocation5 + $0x50] sm:$0xff] }
 0x33e   :  { %v994_v44 = vpop.permute.xlu0 %993 }
 0x33f   :  { %v5003_v45 = vsub.f32 %v533_v25, %v994_v44  ;;  %v71_v25 = vld [vmem:[%s5394_s5] sm:$0xff]  ;;  %v1482_v44 = vand.u32 4294901760, %v62_v42  ;;  %s4857_s5 = smov [#allocation7]  }
 0x340   :  { %s4147_s28 = sshll.u32 %s4857_s5, 4  ;;  %s4148_s28 = int_to_ptr.vmem [resolvable:$true] %s4147_s28 }
 0x341   :  { %v997_v46 = vmul.f32 %v5003_v45, %v5003_v45  ;;  %s4819_s29 = scalar_lea.vmem %s4148_s28, 512  ;;  %p4824_p3 = scmp.lt.s32.totalorder %s4148_s28, %s4148_s28 }
 0x342   :  { %p4820_p2 = scmp.ne.s32.totalorder %s4148_s28, %s4819_s29  ;;  %p4825_p4 = scmp.lt.s32.totalorder %s4819_s29, %s4819_s29 }
 0x343   :  { %v998_v47 = vsel %vm537_vm2, %v997_v46, 0.0  ;;  %v1486_v46 = vand.u32 4294901760, %v64_v43 }
 0x344   :  { %999 = vadd.xlane.f32.xlu1 %v998_v47  ;;  %v5077_v47 = vpack.c.bf16 %v1484_v41, %v1480_v40  ;;  %p4826_p5 = por %p4825_p4, %p4824_p3 }
 0x346   :  { %p4827_p6 = pnand %p4826_p5, %p4820_p2 }
 0x3d1   :  { %v1000_v48 = vpop.xlane.xlu1 %999 }
 0x3d2   :  { %v1002_v49 = vand.u32 4294901760, %v1000_v48 }
 0x3d4   :  { %v1079_v50 = vsub.f32 %v1000_v48, %v1002_v49  ;;  %4317 = vmatpush3.msra.mxu1 %v1002_v49 }
 0x3d5   :  { %4319 = vmatmul.mubr.f32.vlgmr.msra.gmra.mrb[2].mxu1 %v4977_v36  ;;  %4321 = vmatprep.subr.mxu1 %v5396_v1 }
 0x3d6   :  { %v1080_v51 = vand.u32 4294901760, %v1079_v50  ;;  %4323 = vmatprep.mubr.msk.f32.mxu1 %vm4854_vm0, %v5396_v1 }
 0x3d8   :  { %v1081_v52 = vsub.f32 %v1079_v50, %v1080_v51 }
 0x3da   :  { %v1082_v53 = vand.u32 4294901760, %v1081_v52  ;;  %v69_v52 = vld [vmem:[#allocation5 + $0x78] sm:$0xff] }
 0x3db   :  { %v1492_v56 = vand.u32 4294901760, %v69_v52 }
 0x3dc   :  { %4322 = vmatpush3.msra.mxu1 %v1082_v53  ;;  %v5085_v53 = vsub.f32 %v54_v17, %v1466_v19 }
 0x3dd   :  { %4324 = vmatmul.mubr.f32.vlgmr.msra.gmra.mrb[2].mxu1 %v4967_v31  ;;  %4326 = vmatprep.subr.mxu1 %v5396_v1 }
 0x3de   :  { %4327 = vmatpush3.msra.mxu1 %v1079_v50  ;;  %4328 = vmatprep.mubr.msk.f32.mxu1 %vm4854_vm0, %v5396_v1  ;;  %v5083_v50 = vpack.c.bf16 %v1486_v46, %v1482_v44  ;;  %v5402_v63 = vand.u32 4294901760, %v5085_v53 }
 0x3df   :  { %4331 = vmatprep.subr.mxu1 %v5396_v1 }
 0x3e5   :  { %4329 = vmatmul.mubr.f32.vlgmr.msra.gmra.mrb[2].mxu1 %v4970_v32 }
 0x3e6   :  { %4332 = vmatpush3.msra.mxu1 %v1002_v49  ;;  %4333 = vmatprep.mubr.msk.f32.mxu1 %vm4854_vm0, %v5396_v1 }
 0x3e7   :  { %4336 = vmatprep.subr.mxu1 %v5396_v1 }
 0x3ed   :  { %4334 = vmatmul.mubr.f32.vlgmr.msra.gmra.mrb[2].mxu1 %v4973_v33 }
 0x3ee   :  { %4337 = vmatpush3.msra.mxu1 %v1080_v51  ;;  %4338 = vmatprep.mubr.msk.f32.mxu1 %vm4854_vm0, %v5396_v1  ;;  %v67_v51 = vld [vmem:[#allocation5 + $0x68] sm:$0xff] }
 0x3ef   :  { %4341 = vmatprep.subr.mxu1 %v5396_v1  ;;  %v1488_v55 = vand.u32 4294901760, %v67_v51 }
 0x3f1   :  { %v5095_v3 = vpack.c.bf16 %v1492_v56, %v1488_v55 }
 0x3f5   :  { %4339 = vmatmul.mubr.f32.vlgmr.msra.gmra.mrb[2].mxu1 %v4967_v31 }
 0x3f6   :  { %4342 = vmatpush3.msra.mxu1 %v1002_v49  ;;  %4343 = vmatprep.mubr.msk.f32.mxu1 %vm4854_vm0, %v5396_v1  ;;  %v5081_v49 = vsub.f32 %v57_v13, %v1468_v16 }
 0x3f7   :  { %4562 = vmatprep.subr.bf16.mxu1 %v4853_v0 }
 0x3f8   :  { %v5403_v60 = vand.u32 4294901760, %v5081_v49 }
 0x3fd   :  { %4344 = vmatmul.mubr.f32.vlgmr.msra.gmra.mrb[2].mxu1 %v4967_v31 }
 0x3fe   :  { %4564 = vmatpush3.bf16.msra.mxu1 %v4563_v2  ;;  %4350 = vmatprep.mubr.msk.f32.mxu1 %vm4854_vm0, %v5396_v1 }
 0x3ff   :  { %4565 = vmatprep.subr.bf16.mxu1 %v4853_v0 }
 0x401   :  { %4351 = vmatmul.mubr.f32.vlgmr.msra.gmra.mrb[4].mxu1 %v4940_v21 }
 0x402   :  { %4567 = vmatpush3.bf16.msra.mxu1 %v4566_v5  ;;  %4357 = vmatprep.mubr.msk.f32.mxu1 %vm4854_vm0, %v5396_v1  ;;  %v1571_v5 = vsub.f32 %v5081_v49, %v5403_v60 }
 0x403   :  { %4568 = vmatprep.subr.bf16.mxu1 %v4853_v0 }
 0x404   :  { %v1572_v13 = vand.u32 4294901760, %v1571_v5 }
 0x409   :  { %4358 = vmatmul.mubr.f32.vlgmr.msra.gmra.mrb[4].mxu1 %v4929_v8 }
 0x40a   :  { %4570 = vmatpush3.bf16.msra.mxu1 %v4569_v6  ;;  %4364 = vmatprep.mubr.msk.f32.mxu1 %vm4854_vm0, %v5396_v1  ;;  %v5103_v6 = vsub.f32 %v59_v23, %v1472_v26 }
 0x40b   :  { %4571 = vmatprep.subr.bf16.mxu1 %v4853_v0 }
 0x411   :  { %4365 = vmatmul.mubr.f32.vlgmr.msra.gmra.mrb[4].mxu1 %v4932_v12  ;;  %v55_v12 = vld [vmem:[#allocation5 + $0x8] sm:$0xff] }
 0x412   :  { %4573 = vmatpush3.bf16.msra.mxu1 %v4563_v2  ;;  %4371 = vmatprep.mubr.msk.f32.mxu1 %vm4854_vm0, %v5396_v1 }
 0x413   :  { %4574 = vmatprep.subr.bf16.mxu1 %v4853_v0 }
 0x419   :  { %4372 = vmatmul.mubr.f32.vlgmr.msra.gmra.mrb[4].mxu1 %v4935_v15  ;;  %v1464_v15 = vand.u32 4294901760, %v55_v12 }
 0x41a   :  { %4576 = vmatpush3.bf16.msra.mxu1 %v4575_v7  ;;  %4378 = vmatprep.mubr.msk.f32.mxu1 %vm4854_vm0, %v5396_v1  ;;  %v5105_v7 = vpack.c.bf16 %v1494_v62, %v1490_v61 }
 0x41b   :  { %4577 = vmatprep.subr.bf16.mxu1 %v4853_v0  ;;  %v5059_v0 = vld [vmem:[%s5393_s4] sm:$0xff]  ;;  %v5062_v21 = vpack.c.bf16 %v1468_v16, %v1464_v15  ;;  %v5079_v48 = vsub.f32 %v55_v12, %v1464_v15  ;;  %v5117_v15 = vsub.f32 %v58_v28, %v1474_v30  ;;  %v1617_v28 = vsub.f32 %v65_v39, %v1484_v41 }
 0x41c   :  { %v1629_v39 = vsub.f32 %v67_v51, %v1488_v55 }
 0x41d   :  { %4467 = vmatprep.subr.bf16.mxu0 %v5062_v21  ;;  %v5404_v59 = vand.u32 4294901760, %v5079_v48  ;;  %v5398_v23 = vand.u32 4294901760, %v5117_v15  ;;  %v1618_v5 = vand.u32 4294901760, %v1617_v28 }
 0x41e   :  { %4469 = vmatpush1.bf16.msra.mxu0 %v5064_v22 }
 0x41f   :  { %4471 = vmatprep.subr.bf16.mxu0 %v5071_v35  ;;  %v1559_v4 = vsub.f32 %v5079_v48, %v5404_v59  ;;  %v1589_v30 = vsub.f32 %v5117_v15, %v5398_v23 }
 0x421   :  { %4379 = vmatmul.mubr.f32.vlgmr.msra.gmra.mrb[4].mxu1 %v4929_v8  ;;  %v1560_v12 = vand.u32 4294901760, %v1559_v4 }
 0x422   :  { %4579 = vmatpush3.bf16.msra.mxu1 %v4563_v2  ;;  %4385 = vmatprep.mubr.msk.f32.mxu1 %vm4854_vm0, %v5396_v1  ;;  %v5401_v2 = vand.u32 4294901760, %v5087_v54 }
 0x423   :  { %4388 = vmatprep.subr.mxu1 %v5396_v1  ;;  %4473 = vmatpush1.bf16.msra.mxu0 %v5073_v37  ;;  %v5123_v19 = vpack.c.bf16 %v1572_v13, %v1560_v12 }
 0x424   :  { %4475 = vmatprep.subr.bf16.mxu0 %v5077_v47 }
 0x427   :  { %4477 = vmatpush1.bf16.msra.mxu0 %v5083_v50 }
 0x428   :  { %4479 = vmatprep.subr.bf16.mxu0 %v5095_v3 }
 0x429   :  { %4386 = vmatmul.mubr.f32.vlgmr.msra.gmra.mrb[4].mxu1 %v4929_v8 }
 0x42a   :  { %4390 = vmatprep.mubr.msk.f32.mxu1 %vm4854_vm0, %v5396_v1 }
 0x42b   :  { %4481 = vmatpush1.bf16.msra.mxu0 %v5105_v7 }
 0x42c   :  { %4483 = vmatprep.subr.bf16.mxu0 %v5123_v19 }
 0x4d0   :  { %v1443_v9 = vpop.f32.mrb[2].mxu1 }
 0x4d1   :  { %v4676_v10 = vadd.f32 1e-05, %v1443_v9  ;;  %v4345_v11 = vpop.f32.mrb[3].mxu1  ;;  %v1565_v9 = vsub.f32 %v5085_v53, %v5402_v63  ;;  %v1647_v63 = vsub.f32 %v68_v58, %v1494_v62 }
 0x4d2   :  { %v5113_v11 = vsub.f32 %v61_v24, %v1476_v27  ;;  %v5129_v24 = vsub.f32 %v63_v38, %v1480_v40  ;;  %v1611_v38 = vsub.f32 %v62_v42, %v1482_v44 }
 0x4d3   :  { %4771 = vrsqrt.f32 %v4676_v10  ;;  %v1577_v10 = vsub.f32 %v5087_v54, %v5401_v2  ;;  %v1566_v16 = vand.u32 4294901760, %v1565_v9  ;;  %v1623_v9 = vsub.f32 %v64_v43, %v1486_v46 }
 0x4d4   :  { %v5399_v18 = vand.u32 4294901760, %v5113_v11  ;;  %v1612_v13 = vand.u32 4294901760, %v1611_v38  ;;  %v1635_v2 = vsub.f32 %v66_v57, %v1490_v61 }
 0x4d5   :  { %v1578_v17 = vand.u32 4294901760, %v1577_v10  ;;  %v1590_v10 = vand.u32 4294901760, %v1589_v30 }
 0x4d6   :  { %v1595_v26 = vsub.f32 %v5113_v11, %v5399_v18  ;;  %v1613_v23 = vsub.f32 %v1611_v38, %v1612_v13  ;;  %v1630_v18 = vand.u32 4294901760, %v1629_v39  ;;  %v1636_v55 = vand.u32 4294901760, %v1635_v2 }
 0x4d8   :  { %v1596_v40 = vand.u32 4294901760, %v1595_v26  ;;  %v1614_v43 = vand.u32 4294901760, %v1613_v23  ;;  %v1631_v46 = vsub.f32 %v1629_v39, %v1630_v18  ;;  %v1637_v59 = vsub.f32 %v1635_v2, %v1636_v55 }
 0x4d9   :  { %v5162_v23 = vpack.c.bf16 %v5081_v49, %v5079_v48 }
 0x4dd   :  { %v4772_v14 = vpop.eup %4771 }
 0x4de   :  { %v1448_v8 = vmul.f32 %v4772_v14, %v5059_v0  ;;  %v5400_v14 = vand.u32 4294901760, %v5103_v6 }
 0x4e0   :  { %1451 = vperm.xlu0 %4769, %v1448_v8   ;;  %v5121_v8 = vsub.f32 %v60_v29, %v1478_v34  ;;  %v1583_v20 = vsub.f32 %v5103_v6, %v5400_v14  ;;  %v1606_v34 = vand.u32 4294901760, %v5129_v24  ;;  %v1641_v14 = vsub.f32 %v69_v52, %v1492_v56 }
 0x4e2   :  { %v1600_v27 = vand.u32 4294901760, %v5121_v8  ;;  %v1584_v29 = vand.u32 4294901760, %v1583_v20  ;;  %v1607_v12 = vsub.f32 %v5129_v24, %v1606_v34  ;;  %v1624_v20 = vand.u32 4294901760, %v1623_v9 }
 0x4e3   :  { %v1642_v30 = vand.u32 4294901760, %v1641_v14 }
 0x4e4   :  { %1457 = vperm.xlu0 %4769, %v71_v25   ;;  %v5131_v25 = vpack.c.bf16 %v1578_v17, %v1566_v16  ;;  %v1601_v4 = vsub.f32 %v5121_v8, %v1600_v27  ;;  %v5144_v41 = vpack.c.bf16 %v1596_v40, %v1584_v29  ;;  %v1619_v17 = vsub.f32 %v1617_v28, %v1618_v5 }
 0x4e5   :  { %v1608_v1 = vand.u32 4294901760, %v1607_v12  ;;  %v1625_v26 = vsub.f32 %v1623_v9, %v1624_v20  ;;  %v1632_v29 = vand.u32 4294901760, %v1631_v46  ;;  %v1643_v40 = vsub.f32 %v1641_v14, %v1642_v30 }
 0x4e6   :  { %v1602_v16 = vand.u32 4294901760, %v1601_v4  ;;  %v1620_v44 = vand.u32 4294901760, %v1619_v17  ;;  %v1648_v4 = vand.u32 4294901760, %v1647_v63  ;;  %v5166_v17 = vpack.c.bf16 %v5087_v54, %v5085_v53 }
 0x4e7   :  { %v1626_v51 = vand.u32 4294901760, %v1625_v26  ;;  %v1644_v52 = vand.u32 4294901760, %v1643_v40  ;;  %v5177_v26 = vpack.c.bf16 %v1617_v28, %v5129_v24  ;;  %v5181_v46 = vpack.c.bf16 %v1641_v14, %v1629_v39 }
 0x4e8   :  { %v5146_v42 = vpack.c.bf16 %v1602_v16, %v1590_v10  ;;  %v5148_v60 = vpack.c.bf16 %v1620_v44, %v1608_v1  ;;  %v1649_v56 = vsub.f32 %v1647_v63, %v1648_v4  ;;  %v1638_v16 = vand.u32 4294901760, %v1637_v59 }
 0x4e9   :  { %v5150_v12 = vpack.c.bf16 %v1626_v51, %v1614_v43  ;;  %v5156_v58 = vpack.c.bf16 %v1644_v52, %v1632_v29  ;;  %v5170_v59 = vpack.c.bf16 %v5113_v11, %v5103_v6  ;;  %v5174_v44 = vpack.c.bf16 %v5121_v8, %v5117_v15 }
 0x4ea   :  { %v1650_v1 = vand.u32 4294901760, %v1649_v56  ;;  %v5179_v43 = vpack.c.bf16 %v1623_v9, %v1611_v38  ;;  %v5183_v51 = vpack.c.bf16 %v1647_v63, %v1635_v2  ;;  %v5405_v29 = vand.u32 4294901760, %v5079_v48 }
 0x4eb   :  { %v5406_v40 = vand.u32 4294901760, %v5081_v49  ;;  %v5407_v56 = vand.u32 4294901760, %v5085_v53  ;;  %v5408_v8 = vand.u32 4294901760, %v5087_v54  ;;  %v5409_v24 = vand.u32 4294901760, %v5103_v6 }
 0x4ec   :  { %v5158_v62 = vpack.c.bf16 %v1650_v1, %v1638_v16  ;;  %v5410_v28 = vand.u32 4294901760, %v5113_v11  ;;  %v5411_v63 = vand.u32 4294901760, %v5117_v15  ;;  %v5207_v48 = vpack.c.bf16 %v1618_v5, %v1606_v34 }
 0x4ed   :  { %v5189_v52 = vpack.c.bf16 %v5406_v40, %v5405_v29  ;;  %v5195_v16 = vpack.c.bf16 %v5408_v8, %v5407_v56  ;;  %v5209_v49 = vpack.c.bf16 %v1624_v20, %v1612_v13  ;;  %v5211_v38 = vpack.c.bf16 %v1642_v30, %v1630_v18 }
 0x4ee   :  { %v5201_v14 = vpack.c.bf16 %v5410_v28, %v5409_v24  ;;  %v5205_v2 = vpack.c.bf16 %v1600_v27, %v5411_v63  ;;  %v5213_v53 = vpack.c.bf16 %v1648_v4, %v1636_v55  ;;  %v5412_v18 = vmov 0.0  }
 0x4fc   :  { %v5152_v10 = vpop.f32.mrb[4].mxu1 }
 0x4fd   :  { %v4387_v57 = vpop.f32.mrb[5].mxu1  ;;  %v2575_v61 = vsel %vm537_vm2, %v5152_v10, 0.0 }
 0x4fe   :  { %2576 = vadd.xlane.f32.xlu1 %v2575_v61 }
 0x55f   :  { %v1452_v54 = vpop.permute.xlu0 %1451 }
 0x560   :  { %v1454_v9 = vmul.f32 %v1452_v54, %v5003_v45 }
 0x563   :  { %v5216_v6 = vpop.permute.xlu0 %1457 }
 0x564   :  { %v1460_v11 = vadd.f32 %v5216_v6, %v1454_v9 }
 0x566   :  { %v1462_v39 = vsel %vm537_vm2, %v1460_v11, 0 }
 0x567   :  { %v5220_v15 = vand.u32 4294901760, %v1462_v39 }
 0x569   :  { %v1546_v27 = vsub.f32 %v1462_v39, %v5220_v15 }
 0x56b   :  { %v1547_v34 = vand.u32 4294901760, %v1546_v27 }
 0x56d   :  { %v1548_v5 = vsub.f32 %v1546_v27, %v1547_v34 }
 0x56f   :  { %v1549_v13 = vand.u32 4294901760, %v1548_v5 }
 0x571   :  { %1550 = vmatmul.mubr.f32.vlgmr.msra.gmra.mrb[2].mxu0 %v1549_v13 }
 0x572   :  { %4485 = vmatpush1.bf16.msra.mxu0 %v5131_v25  ;;  %1700 = vmatprep.mubr.f32.mxu0 %v5412_v18 }
 0x573   :  { %4487 = vmatprep.subr.bf16.mxu0 %v5144_v41 }
 0x576   :  { %4489 = vmatpush1.bf16.msra.mxu0 %v5146_v42 }
 0x577   :  { %4491 = vmatprep.subr.bf16.mxu0 %v5148_v60 }
 0x57a   :  { %4493 = vmatpush1.bf16.msra.mxu0 %v5150_v12 }
 0x57b   :  { %4495 = vmatprep.subr.bf16.mxu0 %v5156_v58 }
 0x57e   :  { %4497 = vmatpush1.bf16.msra.mxu0 %v5158_v62 }
 0x57f   :  { %4499 = vmatprep.subr.bf16.mxu0 %v5162_v23 }
 0x581   :  { %1702 = vmatmul.mubr.f32.vlgmr.msra.gmra.mrb[2].mxu0 %v5220_v15 }
 0x582   :  { %4501 = vmatpush1.bf16.msra.mxu0 %v5166_v17  ;;  %1804 = vmatprep.mubr.f32.mxu0 %v5412_v18 }
 0x583   :  { %4503 = vmatprep.subr.bf16.mxu0 %v5170_v59 }
 0x586   :  { %4505 = vmatpush1.bf16.msra.mxu0 %v5174_v44 }
 0x587   :  { %4507 = vmatprep.subr.bf16.mxu0 %v5177_v26 }
 0x58a   :  { %4509 = vmatpush1.bf16.msra.mxu0 %v5179_v43 }
 0x58b   :  { %v2577_v45 = vpop.xlane.xlu1 %2576  ;;  %4511 = vmatprep.subr.bf16.mxu0 %v5181_v46 }
 0x58c   :  { %v2579_v20 = vand.u32 4294901760, %v2577_v45 }
 0x58e   :  { %v2656_v30 = vsub.f32 %v2577_v45, %v2579_v20  ;;  %4513 = vmatpush1.bf16.msra.mxu0 %v5183_v51  ;;  %4389 = vmatpush3.msra.mxu1 %v2579_v20 }
 0x58f   :  { %4391 = vmatmul.mubr.f32.vlgmr.msra.gmra.mrb[6].mxu1 %v4977_v36  ;;  %4515 = vmatprep.subr.bf16.mxu0 %v5062_v21 }
 0x590   :  { %v2657_v55 = vand.u32 4294901760, %v2656_v30  ;;  %4393 = vmatprep.subr.mxu1 %v5412_v18  ;;  %4395 = vmatprep.mubr.msk.f32.mxu1 %vm4854_vm0, %v5412_v18 }
 0x591   :  { %1807 = vmatmul.mubr.f32.vlgmr.msra.gmra.mrb[2].mxu0 %v1546_v27 }
 0x592   :  { %v2658_v4 = vsub.f32 %v2656_v30, %v2657_v55  ;;  %4517 = vmatpush1.bf16.msra.mxu0 %v5064_v22  ;;  %1893 = vmatprep.mubr.f32.mxu0 %v5412_v18 }
 0x593   :  { %4519 = vmatprep.subr.bf16.mxu0 %v5071_v35 }
 0x594   :  { %v2659_v57 = vand.u32 4294901760, %v2658_v4 }
 0x596   :  { %4521 = vmatpush1.bf16.msra.mxu0 %v5073_v37  ;;  %4394 = vmatpush3.msra.mxu1 %v2659_v57 }
 0x597   :  { %4396 = vmatmul.mubr.f32.vlgmr.msra.gmra.mrb[6].mxu1 %v4967_v31  ;;  %4398 = vmatprep.subr.mxu1 %v5412_v18 }
 0x598   :  { %4523 = vmatprep.subr.bf16.mxu0 %v5077_v47  ;;  %4399 = vmatpush3.msra.mxu1 %v2656_v30 }
 0x599   :  { %4400 = vmatprep.mubr.msk.f32.mxu1 %vm4854_vm0, %v5412_v18  ;;  %4403 = vmatprep.subr.mxu1 %v5412_v18 }
 0x59a   :  { %4525 = vmatpush1.bf16.msra.mxu0 %v5083_v50 }
 0x59b   :  { %4527 = vmatprep.subr.bf16.mxu0 %v5095_v3 }
 0x59e   :  { %4529 = vmatpush1.bf16.msra.mxu0 %v5105_v7 }
 0x59f   :  { %4401 = vmatmul.mubr.f32.vlgmr.msra.gmra.mrb[6].mxu1 %v4970_v32  ;;  %4531 = vmatprep.subr.bf16.mxu0 %v5189_v52 }
 0x5a0   :  { %4404 = vmatpush3.msra.mxu1 %v2579_v20  ;;  %4405 = vmatprep.mubr.msk.f32.mxu1 %vm4854_vm0, %v5412_v18 }
 0x5a1   :  { %1897 = vmatmul.mubr.f32.vlgmr.msra.gmra.mrb[2].mxu0 %v1547_v34  ;;  %4408 = vmatprep.subr.mxu1 %v5412_v18 }
 0x5a2   :  { %4533 = vmatpush1.bf16.msra.mxu0 %v5195_v16  ;;  %2015 = vmatprep.mubr.f32.mxu0 %v5412_v18 }
 0x5a3   :  { %4535 = vmatprep.subr.bf16.mxu0 %v5201_v14 }
 0x5a6   :  { %4537 = vmatpush1.bf16.msra.mxu0 %v5205_v2 }
 0x5a7   :  { %4406 = vmatmul.mubr.f32.vlgmr.msra.gmra.mrb[6].mxu1 %v4973_v33  ;;  %4539 = vmatprep.subr.bf16.mxu0 %v5207_v48 }
 0x5a8   :  { %4409 = vmatpush3.msra.mxu1 %v2657_v55  ;;  %4410 = vmatprep.mubr.msk.f32.mxu1 %vm4854_vm0, %v5412_v18 }
 0x5a9   :  { %4413 = vmatprep.subr.mxu1 %v5412_v18 }
 0x5aa   :  { %4541 = vmatpush1.bf16.msra.mxu0 %v5209_v49 }
 0x5ab   :  { %4543 = vmatprep.subr.bf16.mxu0 %v5211_v38 }
 0x5ae   :  { %4545 = vmatpush1.bf16.msra.mxu0 %v5213_v53 }
 0x5af   :  { %4411 = vmatmul.mubr.f32.vlgmr.msra.gmra.mrb[6].mxu1 %v4967_v31  ;;  %4547 = vmatprep.subr.bf16.mxu0 %v5062_v21 }
 0x5b0   :  { %4414 = vmatpush3.msra.mxu1 %v2579_v20  ;;  %4415 = vmatprep.mubr.msk.f32.mxu1 %vm4854_vm0, %v5412_v18 }
 0x5b1   :  { %2017 = vmatmul.mubr.f32.vlgmr.msra.gmra.mrb[2].mxu0 %v5220_v15  ;;  %4418 = vmatprep.subr.mxu1 %v5412_v18 }
 0x5b2   :  { %4549 = vmatpush1.bf16.msra.mxu0 %v5064_v22  ;;  %2103 = vmatprep.mubr.f32.mxu0 %v5412_v18 }
 0x5b3   :  { %4551 = vmatprep.subr.bf16.mxu0 %v5071_v35 }
 0x5b6   :  { %4553 = vmatpush1.bf16.msra.mxu0 %v5073_v37 }
 0x5b7   :  { %4416 = vmatmul.mubr.f32.vlgmr.msra.gmra.mrb[6].mxu1 %v4967_v31  ;;  %4555 = vmatprep.subr.bf16.mxu0 %v5077_v47 }
 0x5b8   :  { %4420 = vmatprep.mubr.msk.f32.mxu1 %vm4854_vm0, %v5412_v18 }
 0x5ba   :  { %4557 = vmatpush1.bf16.msra.mxu0 %v5083_v50 }
 0x5bb   :  { %4559 = vmatprep.subr.bf16.mxu0 %v5095_v3 }
 0x5be   :  { %4561 = vmatpush1.bf16.msra.mxu0 %v5105_v7 }
 0x5bf   :  { %4581 = vmatprep.subr.bf16.mxu0 %v5062_v21 }
 0x5c1   :  { %2105 = vmatmul.mubr.f32.vlgmr.msra.gmra.mrb[2].mxu0 %v5220_v15 }
 0x5c2   :  { %4583 = vmatpush1.bf16.msra.mxu0 %v5064_v22  ;;  %3572 = vmatprep.mubr.f32.mxu0 %v5412_v18 }
 0x5c3   :  { %4585 = vmatprep.subr.bf16.mxu0 %v5071_v35 }
 0x5c6   :  { %4587 = vmatpush1.bf16.msra.mxu0 %v5073_v37 }
 0x5c7   :  { %4589 = vmatprep.subr.bf16.mxu0 %v5077_v47 }
 0x5ca   :  { %4591 = vmatpush1.bf16.msra.mxu0 %v5083_v50 }
 0x5cb   :  { %4593 = vmatprep.subr.bf16.mxu0 %v5095_v3 }
 0x5ce   :  { %4595 = vmatpush1.bf16.msra.mxu0 %v5105_v7 }
 0x5cf   :  { %4597 = vmatprep.subr.bf16.mxu0 %v5123_v19 }
 0x68a   :  { %v3020_v61 = vpop.f32.mrb[6].mxu1 }
 0x68b   :  { %3026 = vperm.xlu1 %4770, %v3020_v61   ;;  %v4417_v1 = vpop.f32.mrb[7].mxu1 }
 0x694   :  { %v2106_v29 = vpop.f32.mrb[2].mxu0 }
 0x695   :  { %2111 = vst [vmem:[#allocation7] sm:$0xff] %v2106_v29  ;;  %v2108_v40 = vpop.f32.mrb[3].mxu0 }
 0x696   :  { %2112 = vst [vmem:[#allocation7 + $0x8] sm:$0xff] %v2108_v40 }
 0x70a   :  { %v3027_v56 = vpop.permute.xlu1 %3026 }
 0x70b   :  { %v3029_v8 = vsub.f32 %v5152_v10, %v3027_v56 }
 0x70d   :  { %v3030_v24 = vmul.f32 %v3029_v8, %v3029_v8 }
 0x70f   :  { %v3031_v28 = vsel %vm537_vm2, %v3030_v24, 0.0 }
 0x710   :  { %3032 = vadd.xlane.f32.xlu1 %v3031_v28 }
 0x79d   :  { %v3033_v63 = vpop.xlane.xlu1 %3032 }
 0x79e   :  { %v3035_v54 = vand.u32 4294901760, %v3033_v63 }
 0x7a0   :  { %v3112_v9 = vsub.f32 %v3033_v63, %v3035_v54  ;;  %4419 = vmatpush3.msra.mxu1 %v3035_v54 }
 0x7a1   :  { %4421 = vmatmul.mubr.f32.vlgmr.msra.gmra.mrb[8].mxu1 %v4977_v36  ;;  %4423 = vmatprep.subr.mxu1 %v5412_v18 }
 0x7a2   :  { %v3113_v19 = vand.u32 4294901760, %v3112_v9  ;;  %4425 = vmatprep.mubr.msk.f32.mxu1 %vm4854_vm0, %v5412_v18 }
 0x7a4   :  { %v3114_v11 = vsub.f32 %v3112_v9, %v3113_v19 }
 0x7a6   :  { %v3115_v39 = vand.u32 4294901760, %v3114_v11 }
 0x7a8   :  { %4424 = vmatpush3.msra.mxu1 %v3115_v39 }
 0x7a9   :  { %4426 = vmatmul.mubr.f32.vlgmr.msra.gmra.mrb[8].mxu1 %v4967_v31  ;;  %4428 = vmatprep.subr.mxu1 %v5412_v18 }
 0x7aa   :  { %4429 = vmatpush3.msra.mxu1 %v3112_v9  ;;  %4430 = vmatprep.mubr.msk.f32.mxu1 %vm4854_vm0, %v5412_v18 }
 0x7ab   :  { %4433 = vmatprep.subr.mxu1 %v5412_v18 }
 0x7b1   :  { %4431 = vmatmul.mubr.f32.vlgmr.msra.gmra.mrb[8].mxu1 %v4970_v32 }
 0x7b2   :  { %4434 = vmatpush3.msra.mxu1 %v3035_v54  ;;  %4435 = vmatprep.mubr.msk.f32.mxu1 %vm4854_vm0, %v5412_v18 }
 0x7b3   :  { %4438 = vmatprep.subr.mxu1 %v5412_v18 }
 0x7b9   :  { %4436 = vmatmul.mubr.f32.vlgmr.msra.gmra.mrb[8].mxu1 %v4973_v33 }
 0x7ba   :  { %4439 = vmatpush3.msra.mxu1 %v3113_v19  ;;  %4440 = vmatprep.mubr.msk.f32.mxu1 %vm4854_vm0, %v5412_v18 }
 0x7bb   :  { %4443 = vmatprep.subr.mxu1 %v5412_v18 }
 0x7c1   :  { %4441 = vmatmul.mubr.f32.vlgmr.msra.gmra.mrb[8].mxu1 %v4967_v31 }
 0x7c2   :  { %4444 = vmatpush3.msra.mxu1 %v3035_v54  ;;  %4445 = vmatprep.mubr.msk.f32.mxu1 %vm4854_vm0, %v5412_v18 }
 0x7c3   :  { %4629 = vmatprep.subr.bf16.mxu1 %v5062_v21 }
 0x7c9   :  { %4446 = vmatmul.mubr.f32.vlgmr.msra.gmra.mrb[8].mxu1 %v4967_v31 }
 0x7ca   :  { %4631 = vmatpush1.bf16.msra.mxu1 %v5064_v22  ;;  %3921 = vmatprep.mubr.f32.mxu1 %v5412_v18 }
 0x7cb   :  { %4633 = vmatprep.subr.bf16.mxu1 %v5071_v35 }
 0x7ce   :  { %4635 = vmatpush1.bf16.msra.mxu1 %v5073_v37 }
 0x7cf   :  { %4637 = vmatprep.subr.bf16.mxu1 %v5077_v47 }
 0x7d2   :  { %4639 = vmatpush1.bf16.msra.mxu1 %v5083_v50 }
 0x7d3   :  { %4641 = vmatprep.subr.bf16.mxu1 %v5095_v3 }
 0x7d6   :  { %4643 = vmatpush1.bf16.msra.mxu1 %v5105_v7 }
 0x7d7   :  { %4645 = vmatprep.subr.bf16.mxu1 %v5189_v52 }
 0x89c   :  { %v3476_v32 = vpop.f32.mrb[8].mxu1 }
 0x89d   :  { %v4677_v31 = vadd.f32 1e-05, %v3476_v32  ;;  %v4447_v33 = vpop.f32.mrb[9].mxu1 }
 0x89f   :  { %4773 = vrsqrt.f32 %v4677_v31 }
 0x8a9   :  { %v4774_v36 = vpop.eup %4773 }
 0x8aa   :  { %v3481_v10 = vmul.f32 %v4774_v36, %v5059_v0 }
 0x8ac   :  { %3484 = vperm.xlu0 %4769, %v3481_v10  }
 0x92b   :  { %v3485_v15 = vpop.permute.xlu0 %3484 }
 0x92c   :  { %v3487_v27 = vmul.f32 %v3485_v15, %v3029_v8 }
 0x92e   :  { %v3488_v34 = vadd.f32 %v3487_v27, %v5216_v6 }
 0x930   :  { %v3490_v5 = vsel %vm537_vm2, %v3488_v34, 0 }
 0x931   :  { %v3573_v13 = vand.u32 4294901760, %v3490_v5 }
 0x933   :  { %v3574_v45 = vsub.f32 %v3490_v5, %v3573_v13 }
 0x935   :  { %v3575_v20 = vand.u32 4294901760, %v3574_v45 }
 0x937   :  { %3925 = vmatmul.mubr.f32.vlgmr.msra.gmra.mrb[10].mxu1 %v3575_v20  ;;  %v3576_v30 = vsub.f32 %v3574_v45, %v3575_v20 }
 0x938   :  { %4647 = vmatpush1.bf16.msra.mxu1 %v5195_v16  ;;  %4043 = vmatprep.mubr.f32.mxu1 %v5412_v18 }
 0x939   :  { %4649 = vmatprep.subr.bf16.mxu1 %v5201_v14  ;;  %v3577_v52 = vand.u32 4294901760, %v3576_v30 }
 0x93b   :  { %3578 = vmatmul.mubr.f32.vlgmr.msra.gmra.mrb[4].mxu0 %v3577_v52 }
 0x93c   :  { %4599 = vmatpush1.bf16.msra.mxu0 %v5131_v25  ;;  %4651 = vmatpush1.bf16.msra.mxu1 %v5205_v2 }
 0x93d   :  { %4601 = vmatprep.subr.bf16.mxu0 %v5144_v41  ;;  %4653 = vmatprep.subr.bf16.mxu1 %v5207_v48 }
 0x93e   :  { %3728 = vmatprep.mubr.f32.mxu0 %v5412_v18 }
 0x940   :  { %4603 = vmatpush1.bf16.msra.mxu0 %v5146_v42  ;;  %4655 = vmatpush1.bf16.msra.mxu1 %v5209_v49 }
 0x941   :  { %4605 = vmatprep.subr.bf16.mxu0 %v5148_v60  ;;  %4657 = vmatprep.subr.bf16.mxu1 %v5211_v38 }
 0x944   :  { %4607 = vmatpush1.bf16.msra.mxu0 %v5150_v12  ;;  %4659 = vmatpush1.bf16.msra.mxu1 %v5213_v53 }
 0x945   :  { %4609 = vmatprep.subr.bf16.mxu0 %v5156_v58  ;;  %4661 = vmatprep.subr.bf16.mxu1 %v5062_v21 }
 0x947   :  { %4045 = vmatmul.mubr.f32.vlgmr.msra.gmra.mrb[10].mxu1 %v3573_v13 }
 0x948   :  { %4611 = vmatpush1.bf16.msra.mxu0 %v5158_v62  ;;  %4663 = vmatpush1.bf16.msra.mxu1 %v5064_v22 }
 0x949   :  { %4613 = vmatprep.subr.bf16.mxu0 %v5162_v23  ;;  %4665 = vmatprep.subr.bf16.mxu1 %v5071_v35 }
 0x94a   :  { %4131 = vmatprep.mubr.f32.mxu1 %v5412_v18 }
 0x94b   :  { %3730 = vmatmul.mubr.f32.vlgmr.msra.gmra.mrb[4].mxu0 %v3573_v13 }
 0x94c   :  { %4615 = vmatpush1.bf16.msra.mxu0 %v5166_v17  ;;  %4667 = vmatpush1.bf16.msra.mxu1 %v5073_v37 }
 0x94d   :  { %4617 = vmatprep.subr.bf16.mxu0 %v5170_v59  ;;  %4669 = vmatprep.subr.bf16.mxu1 %v5077_v47 }
 0x94e   :  { %3832 = vmatprep.mubr.f32.mxu0 %v5412_v18 }
 0x950   :  { %4619 = vmatpush1.bf16.msra.mxu0 %v5174_v44  ;;  %4671 = vmatpush1.bf16.msra.mxu1 %v5083_v50 }
 0x951   :  { %4621 = vmatprep.subr.bf16.mxu0 %v5177_v26  ;;  %4673 = vmatprep.subr.bf16.mxu1 %v5095_v3 }
 0x954   :  { %4623 = vmatpush1.bf16.msra.mxu0 %v5179_v43  ;;  %4675 = vmatpush1.bf16.msra.mxu1 %v5105_v7 }
 0x955   :  { %4625 = vmatprep.subr.bf16.mxu0 %v5181_v46 }
 0x957   :  { %4133 = vmatmul.mubr.f32.vlgmr.msra.gmra.mrb[10].mxu1 %v3573_v13 }
 0x958   :  { %4627 = vmatpush1.bf16.msra.mxu0 %v5183_v51 }
 0x95b   :  { %3835 = vmatmul.mubr.f32.vlgmr.msra.gmra.mrb[4].mxu0 %v3574_v45 }
 0xa2a   :  { %v4134_v0 = vpop.f32.mrb[10].mxu1 }
 0xa2b   :  { %v4136_v21 = vpop.f32.mrb[11].mxu1 }
 0xa2e   :  { %v3836_v22 = vpop.f32.mrb[4].mxu0 }
 0xa2f   :  { %v4678_v35 = vadd.f32 %v4134_v0, %v3836_v22  ;;  %v3838_v37 = vpop.f32.mrb[5].mxu0 }
 0xa30   :  { %v4679_v47 = vadd.f32 %v4136_v21, %v3838_v37 }
 0xa31   :  { %4140 = vst [vmem:[#allocation7 + $0x10] sm:$0xff] %v4678_v35 }
 0xa32   :  { %4141 = vst [vmem:[#allocation7 + $0x18] sm:$0xff] %v4679_v47 }
 0xa33   :  { %4830 = shalt.err (!%p4827_p6)
}
 0xa34   :  { %s4831_s8 = scalar_lea.hbm %s5395_s6, 512 }
 0xa35   :  { %p4832_p7 = scmp.ne.s32.totalorder %s5395_s6, %s4831_s8  ;;  %p4835_p8 = scmp.lt.u32.totalorder %s4831_s8, %s5395_s6 }
 0xa37   :  { %p4837_p9 = pnand %p4835_p8, %p4832_p7 }
 0xa39   :  { %4840 = shalt.err (!%p4837_p9)
}
 0xa3a   :  { %4153 = dma.vmem_to_hbm [thread:$0]  %s4148_s28, 512, %s5395_s6, [#allocation4], %s4851_s0, %s4851_s0, %s4852_s21  }
 0xa3b   :  { %4845 = dma.done.wait [#allocation4], 512  }
 0xa3c   :  { %4846 = vsyncadd [#allocation4], 4294966784 }
 0xa3d   :  { %4157 = vsyncpa [#allocation3], 1 }
 0xa3e   :  { %4158 = vsyncpa [#allocation6], 1 }
 0xa3f   :  { %4159 = vsyncpa [#allocation4], 1 }

</bundles_post_ra>
